<compile_context>
chip_gen: v7x
topology: tpu7x:2x2x1
jax: 0.10.0
libtpu: 0.0.40
codegen_flags: <defaults>
</compile_context>

<pallas_src>
import functools

import jax
import jax.numpy as jnp
from jax.experimental import pallas as pl
from jax.experimental.pallas import tpu as pltpu


def _expand_conv_weight(w_hwio, W, out_dtype=jnp.bfloat16):
    """(K, K, C, C) HWIO conv weight -> (K*W*C, W*C) kh-stacked block-banded matrix.

    Rows [kh*W*C : (kh+1)*W*C] hold big_kh with
        big_kh[wi*C + ci, wo*C + co] = w[kh, wi - wo + p, ci, co]   (valid taps only),
    so a "same" conv along width (including its zero padding) becomes one dense
    matmul per kh tap on an (M, W*C) activation slab, and stacking the kh blocks
    lets all K taps contract in a single depth-(K*W*C) matmul.
    """
    K, K2, C, Co = w_hwio.shape
    assert K == K2 and C == Co
    p = K // 2
    blocks = []
    for kh in range(K):
        blk = jnp.zeros((W * C, W * C), jnp.float32)
        for kw in range(K):
            sel = jnp.eye(W, k=p - kw, dtype=jnp.float32)   # wi - wo == kw - p
            blk = blk + jnp.kron(sel, w_hwio[kh, kw].astype(jnp.float32))
        blocks.append(blk)
    return jnp.concatenate(blocks, axis=0).astype(out_dtype)


def _resblock_kernel(x_ref, w1_ref, b1_ref, w2_ref, b2_ref, o_ref,
                     *, NB, H, Wc, K, p, res_scale, fuse_taps):
    """One grid step = NB images (M = NB*H matmul rows).

    x_ref   : (NB, H, Wc)  f32   lane-dense input (Wc = W*C); also the residual
    w*_ref  : (K*Wc, Wc)   bf16  kh-stacked block-banded expanded conv weights
    b*_ref  : (1, Wc)      f32   bias tiled across W
    o_ref   : (NB, H, Wc)        output
    """
    M = NB * H

    x = x_ref[...]                          # (NB, H, Wc) f32
    x2d = x.reshape(M, Wc)                  # residual stream, stays f32

    def shifted_slab(src3d, kh):
        # slab[b, h, :] = src[b, h + kh - p, :], zero rows at each image's H edges
        # (the per-image height "same" padding), flattened to (M, Wc).
        d = kh - p
        if d == 0:
            sl = src3d
        elif d < 0:
            sl = jnp.concatenate(
                [jnp.zeros((NB, -d, Wc), src3d.dtype), src3d[:, :H + d, :]], axis=1)
        else:
            sl = jnp.concatenate(
                [src3d[:, d:, :], jnp.zeros((NB, d, Wc), src3d.dtype)], axis=1)
        return sl.reshape(M, Wc)

    def conv(src3d_f32, w_ref, b_ref):
        # Cast once per conv (not per tap); matmuls in bf16, accumulate in f32.
        src3d = src3d_f32.astype(jnp.bfloat16)
        if fuse_taps:
            # One depth-(K*Wc) matmul: fills the 256-deep v6e/v7x MXU and keeps a
            # single accumulation on the result path.
            lhs = jnp.concatenate([shifted_slab(src3d, kh) for kh in range(K)],
                                  axis=1)                      # (M, K*Wc) bf16
            acc = jnp.dot(lhs, w_ref[...],
                          preferred_element_type=jnp.float32)  # (M, Wc) f32
        else:
            # v5e-preferred: K depth-Wc (M,128)@(128,128) matmuls.
            acc = jnp.zeros((M, Wc), jnp.float32)
            for kh in range(K):
                acc = acc + jnp.dot(shifted_slab(src3d, kh),
                                    w_ref[kh * Wc:(kh + 1) * Wc, :],
                                    preferred_element_type=jnp.float32)
        return acc + b_ref[...]             # f32 elementwise

    y = jnp.maximum(conv(x, w1_ref, b1_ref), 0.0)              # conv1 + bias + ReLU
    res = conv(y.reshape(NB, H, Wc), w2_ref, b2_ref) * res_scale + x2d
    o_ref[...] = res.reshape(NB, H, Wc).astype(o_ref.dtype)


def resblock_pallas(x_nhwc, w1, b1, w2, b2, *, res_scale=1.0,
                    block_n=8, fuse_kh_taps=True):
    """x_nhwc: (N, H, W, C); w*: (K, K, C, C) HWIO; b*: (C,)."""
    N, H, W, C = x_nhwc.shape
    K = w1.shape[0]
    p = K // 2
    Wc = W * C

    # Batch block: target M = NB*H >= 128 rows per MXU matmul.
    NB = max(1, min(block_n, N))
    while N % NB:
        NB -= 1

    # Lane-dense views / packed params (reshape is free: C is innermost).
    x2 = x_nhwc.reshape(N, H, Wc)
    w1s = _expand_conv_weight(w1, W)                 # (K*Wc, Wc) bf16
    w2s = _expand_conv_weight(w2, W)
    b1r = jnp.tile(b1.astype(jnp.float32), W).reshape(1, Wc)
    b2r = jnp.tile(b2.astype(jnp.float32), W).reshape(1, Wc)

    kernel = functools.partial(
        _resblock_kernel, NB=NB, H=H, Wc=Wc, K=K, p=p,
        res_scale=float(res_scale), fuse_taps=fuse_kh_taps)

    out2 = pl.pallas_call(
        kernel,
        out_shape=jax.ShapeDtypeStruct((N, H, Wc), x_nhwc.dtype),
        grid_spec=pltpu.PrefetchScalarGridSpec(
            num_scalar_prefetch=0,
            grid=(N // NB,),
            in_specs=[
                pl.BlockSpec((NB, H, Wc), lambda n: (n, 0, 0)),   # x (and residual)
                pl.BlockSpec((K * Wc, Wc), lambda n: (0, 0)),     # w1 (constant idx -> DMA'd once)
                pl.BlockSpec((1, Wc), lambda n: (0, 0)),          # b1 (tiled)
                pl.BlockSpec((K * Wc, Wc), lambda n: (0, 0)),     # w2
                pl.BlockSpec((1, Wc), lambda n: (0, 0)),          # b2
            ],
            out_specs=pl.BlockSpec((NB, H, Wc), lambda n: (n, 0, 0)),
        ),
        compiler_params=pltpu.CompilerParams(
            dimension_semantics=("parallel",)),     # batch blocks shard across TCs
    )(x2, w1s, b1r, w2s, b2r)

    return out2.reshape(N, H, W, C)


def resblock_reference(x_nhwc, w1, b1, w2, b2, *, res_scale=1.0):
    """Pure-JAX f32 reference mirroring the PyTorch ResBlock forward."""
    dn = ("NHWC", "HWIO", "NHWC")
    y = jax.lax.conv_general_dilated(x_nhwc, w1, (1, 1), "SAME",
                                     dimension_numbers=dn) + b1
    y = jnp.maximum(y, 0.0)
    y = jax.lax.conv_general_dilated(y, w2, (1, 1), "SAME",
                                     dimension_numbers=dn) + b2
    return y * res_scale + x_nhwc


if __name__ == "__main__":
    # ResBlock(conv, n_feat=8, kernel_size=3): W*C = 128 lanes, NB*H = 128 MXU rows,
    # grid=(8,) so each v7x TensorCore executes 4 pipelined steps.
    N, C, H, W, K = 64, 8, 16, 16, 3
    res_scale = 1.0

    key = jax.random.PRNGKey(0)
    kx, kw1, kb1, kw2, kb2 = jax.random.split(key, 5)

    # NCHW input (PyTorch convention) transposed to NHWC at the boundary.
    x_nchw = jax.random.normal(kx, (N, C, H, W), jnp.float32)
    x_nhwc = jnp.transpose(x_nchw, (0, 2, 3, 1))

    fan_in = C * K * K
    scale = 1.0 / (fan_in ** 0.5)
    w1 = jax.random.uniform(kw1, (K, K, C, C), jnp.float32, -scale, scale)
    b1 = jax.random.uniform(kb1, (C,), jnp.float32, -scale, scale)
    w2 = jax.random.uniform(kw2, (K, K, C, C), jnp.float32, -scale, scale)
    b2 = jax.random.uniform(kb2, (C,), jnp.float32, -scale, scale)

    ref = resblock_reference(x_nhwc, w1, b1, w2, b2, res_scale=res_scale)

    # Fused kh-tap path (default; best for the 256-deep v6e/v7x MXU).
    out = resblock_pallas(x_nhwc, w1, b1, w2, b2, res_scale=res_scale,
                          fuse_kh_taps=True)
    out = jax.block_until_ready(out)
    assert out.shape == (N, H, W, C)
    # bf16 matmul operands with f32 accumulation -> compare loosely vs f32 ref.
    assert jnp.allclose(out, ref, rtol=5e-2, atol=5e-2), "fused-tap path mismatch"

    # Per-tap path (v5e-preferred shape: depth-128 matmuls), same stacked weights.
    out_t = resblock_pallas(x_nhwc, w1, b1, w2, b2, res_scale=res_scale,
                            fuse_kh_taps=False)
    out_t = jax.block_until_ready(out_t)
    assert jnp.allclose(out_t, ref, rtol=5e-2, atol=5e-2), "per-tap path mismatch"

    print("KERNEL_OK")
</pallas_src>

<mosaic_0001>
module attributes {stable_mosaic.version = 11 : i64} {
  func.func @_resblock_kernel(%arg0: i32, %arg1: memref<8x16x128xf32, #tpu.memory_space<vmem>>, %arg2: memref<384x128xbf16, #tpu.memory_space<vmem>>, %arg3: memref<1x128xf32, #tpu.memory_space<vmem>>, %arg4: memref<384x128xbf16, #tpu.memory_space<vmem>>, %arg5: memref<1x128xf32, #tpu.memory_space<vmem>>, %arg6: memref<8x16x128xf32, #tpu.memory_space<vmem>>) attributes {dimension_semantics = [#tpu.dimension_semantics<parallel>], iteration_bounds = array<i64: 8>, scalar_prefetch = 0 : i64, scratch_operands = 0 : i64, tpu.core_type = #tpu.core_type<tc>, window_params = [{transform_indices = @transform_0, window_bounds = array<i64: 8, 16, 128>}, {pipeline_mode = #tpu.pipeline_mode<synchronous>, transform_indices = @transform_1, window_bounds = array<i64: 384, 128>}, {pipeline_mode = #tpu.pipeline_mode<synchronous>, transform_indices = @transform_2, window_bounds = array<i64: 1, 128>}, {pipeline_mode = #tpu.pipeline_mode<synchronous>, transform_indices = @transform_3, window_bounds = array<i64: 384, 128>}, {pipeline_mode = #tpu.pipeline_mode<synchronous>, transform_indices = @transform_4, window_bounds = array<i64: 1, 128>}, {transform_indices = @transform_5, window_bounds = array<i64: 8, 16, 128>}]} {
    %c0 = arith.constant 0 : index
    %c0_0 = arith.constant 0 : index
    %c0_1 = arith.constant 0 : index
    %0 = vector.load %arg1[%c0, %c0_0, %c0_1] : memref<8x16x128xf32, #tpu.memory_space<vmem>>, vector<8x16x128xf32>
    %1 = vector.shape_cast %0 : vector<8x16x128xf32> to vector<128x128xf32>
    %2 = arith.truncf %0 : vector<8x16x128xf32> to vector<8x16x128xbf16>
    %cst = arith.constant 0.000000e+00 : bf16
    %3 = vector.broadcast %cst : bf16 to vector<8x1x128xbf16>
    %4 = vector.extract_strided_slice %2 {offsets = [0, 0, 0], sizes = [8, 15, 128], strides = [1, 1, 1]} : vector<8x16x128xbf16> to vector<8x15x128xbf16>
    %5 = tpu.concatenate %3, %4 in 1 : vector<8x1x128xbf16>, vector<8x15x128xbf16> -> vector<8x16x128xbf16>
    %6 = vector.shape_cast %5 : vector<8x16x128xbf16> to vector<128x128xbf16>
    %7 = vector.shape_cast %2 : vector<8x16x128xbf16> to vector<128x128xbf16>
    %8 = vector.extract_strided_slice %2 {offsets = [0, 1, 0], sizes = [8, 15, 128], strides = [1, 1, 1]} : vector<8x16x128xbf16> to vector<8x15x128xbf16>
    %cst_2 = arith.constant 0.000000e+00 : bf16
    %9 = vector.broadcast %cst_2 : bf16 to vector<8x1x128xbf16>
    %10 = tpu.concatenate %8, %9 in 1 : vector<8x15x128xbf16>, vector<8x1x128xbf16> -> vector<8x16x128xbf16>
    %11 = vector.shape_cast %10 : vector<8x16x128xbf16> to vector<128x128xbf16>
    %12 = tpu.concatenate %6, %7, %11 in 1 : vector<128x128xbf16>, vector<128x128xbf16>, vector<128x128xbf16> -> vector<128x384xbf16>
    %c0_3 = arith.constant 0 : index
    %c0_4 = arith.constant 0 : index
    %13 = vector.load %arg2[%c0_3, %c0_4] : memref<384x128xbf16, #tpu.memory_space<vmem>>, vector<384x128xbf16>
    %cst_5 = arith.constant dense<0.000000e+00> : vector<128x128xf32>
    %14 = tpu.matmul %12, %13, %cst_5 {dimension_numbers = #tpu.dot_dimension_numbers<[1], [0], [0], [1], [0, 0, 1, 1], [], []>} : vector<128x384xbf16>, vector<384x128xbf16>, vector<128x128xf32> -> vector<128x128xf32>
    %c0_6 = arith.constant 0 : index
    %c0_7 = arith.constant 0 : index
    %15 = vector.load %arg3[%c0_6, %c0_7] : memref<1x128xf32, #tpu.memory_space<vmem>>, vector<1x128xf32>
    %16 = vector.broadcast %15 : vector<1x128xf32> to vector<128x128xf32>
    %17 = arith.addf %14, %16 : vector<128x128xf32>
    %cst_8 = arith.constant 0.000000e+00 : f32
    %18 = vector.broadcast %cst_8 : f32 to vector<128x128xf32>
    %19 = arith.maximumf %17, %18 : vector<128x128xf32>
    %20 = vector.shape_cast %19 : vector<128x128xf32> to vector<8x16x128xf32>
    %21 = arith.truncf %20 : vector<8x16x128xf32> to vector<8x16x128xbf16>
    %cst_9 = arith.constant 0.000000e+00 : bf16
    %22 = vector.broadcast %cst_9 : bf16 to vector<8x1x128xbf16>
    %23 = vector.extract_strided_slice %21 {offsets = [0, 0, 0], sizes = [8, 15, 128], strides = [1, 1, 1]} : vector<8x16x128xbf16> to vector<8x15x128xbf16>
    %24 = tpu.concatenate %22, %23 in 1 : vector<8x1x128xbf16>, vector<8x15x128xbf16> -> vector<8x16x128xbf16>
    %25 = vector.shape_cast %24 : vector<8x16x128xbf16> to vector<128x128xbf16>
    %26 = vector.shape_cast %21 : vector<8x16x128xbf16> to vector<128x128xbf16>
    %27 = vector.extract_strided_slice %21 {offsets = [0, 1, 0], sizes = [8, 15, 128], strides = [1, 1, 1]} : vector<8x16x128xbf16> to vector<8x15x128xbf16>
    %cst_10 = arith.constant 0.000000e+00 : bf16
    %28 = vector.broadcast %cst_10 : bf16 to vector<8x1x128xbf16>
    %29 = tpu.concatenate %27, %28 in 1 : vector<8x15x128xbf16>, vector<8x1x128xbf16> -> vector<8x16x128xbf16>
    %30 = vector.shape_cast %29 : vector<8x16x128xbf16> to vector<128x128xbf16>
    %31 = tpu.concatenate %25, %26, %30 in 1 : vector<128x128xbf16>, vector<128x128xbf16>, vector<128x128xbf16> -> vector<128x384xbf16>
    %c0_11 = arith.constant 0 : index
    %c0_12 = arith.constant 0 : index
    %32 = vector.load %arg4[%c0_11, %c0_12] : memref<384x128xbf16, #tpu.memory_space<vmem>>, vector<384x128xbf16>
    %cst_13 = arith.constant dense<0.000000e+00> : vector<128x128xf32>
    %33 = tpu.matmul %31, %32, %cst_13 {dimension_numbers = #tpu.dot_dimension_numbers<[1], [0], [0], [1], [0, 0, 1, 1], [], []>} : vector<128x384xbf16>, vector<384x128xbf16>, vector<128x128xf32> -> vector<128x128xf32>
    %c0_14 = arith.constant 0 : index
    %c0_15 = arith.constant 0 : index
    %34 = vector.load %arg5[%c0_14, %c0_15] : memref<1x128xf32, #tpu.memory_space<vmem>>, vector<1x128xf32>
    %35 = vector.broadcast %34 : vector<1x128xf32> to vector<128x128xf32>
    %36 = arith.addf %33, %35 : vector<128x128xf32>
    %cst_16 = arith.constant 1.000000e+00 : f32
    %37 = vector.broadcast %cst_16 : f32 to vector<128x128xf32>
    %38 = arith.mulf %36, %37 : vector<128x128xf32>
    %39 = arith.addf %38, %1 : vector<128x128xf32>
    %40 = vector.shape_cast %39 : vector<128x128xf32> to vector<8x16x128xf32>
    %c0_17 = arith.constant 0 : index
    %c0_18 = arith.constant 0 : index
    %c0_19 = arith.constant 0 : index
    %41 = vector.load %arg6[%c0_17, %c0_18, %c0_19] : memref<8x16x128xf32, #tpu.memory_space<vmem>>, vector<8x16x128xf32>
    tpu.vector_store %arg6[%c0_17, %c0_18, %c0_19], %40 {strides = array<i32>} : memref<8x16x128xf32, #tpu.memory_space<vmem>>, vector<8x16x128xf32>,
    return
  }
  func.func @transform_0(%arg0: i32) -> (i32, i32, i32) {
    %c0_i32 = arith.constant 0 : i32
    %c0_i32_0 = arith.constant 0 : i32
    %c0_i32_1 = arith.constant 0 : i32
    return %arg0, %c0_i32, %c0_i32_0 : i32, i32, i32
  }
  func.func @transform_1(%arg0: i32) -> (i32, i32) {
    %c0_i32 = arith.constant 0 : i32
    %c0_i32_0 = arith.constant 0 : i32
    %c0_i32_1 = arith.constant 0 : i32
    return %c0_i32, %c0_i32_0 : i32, i32
  }
  func.func @transform_2(%arg0: i32) -> (i32, i32) {
    %c0_i32 = arith.constant 0 : i32
    %c0_i32_0 = arith.constant 0 : i32
    %c0_i32_1 = arith.constant 0 : i32
    return %c0_i32, %c0_i32_0 : i32, i32
  }
  func.func @transform_3(%arg0: i32) -> (i32, i32) {
    %c0_i32 = arith.constant 0 : i32
    %c0_i32_0 = arith.constant 0 : i32
    %c0_i32_1 = arith.constant 0 : i32
    return %c0_i32, %c0_i32_0 : i32, i32
  }
  func.func @transform_4(%arg0: i32) -> (i32, i32) {
    %c0_i32 = arith.constant 0 : i32
    %c0_i32_0 = arith.constant 0 : i32
    %c0_i32_1 = arith.constant 0 : i32
    return %c0_i32, %c0_i32_0 : i32, i32
  }
  func.func @transform_5(%arg0: i32) -> (i32, i32, i32) {
    %c0_i32 = arith.constant 0 : i32
    %c0_i32_0 = arith.constant 0 : i32
    %c0_i32_1 = arith.constant 0 : i32
    return %arg0, %c0_i32, %c0_i32_0 : i32, i32, i32
  }
}

</mosaic_0001>

<bundles_post_ra>
// kernel: tpu_custom_call.1
= control target key start
LH: loop header
LB: loop body
LE: loop exit
PB: predicated region body
PF: predicated region fallthrough
CT: control target
= control target key end

     0   :  { %10 = vsyncpa [#allocation3], 0  ;;  %s2573_s0 = inlined_call_operand.hbm [shape: f32[64,16,128], index: 0, kind: input, shape index: {}]   ;;  %s2574_s1 = inlined_call_operand.hbm [shape: bf16[384,128], index: 1, kind: input, shape index: {}]   ;;  %s2575_s2 = inlined_call_operand.vmem [shape: f32[1,128], index: 2, kind: input, shape index: {}]   ;;  %s2576_s3 = inlined_call_operand.hbm [shape: bf16[384,128], index: 3, kind: input, shape index: {}]   ;;  %s2577_s4 = inlined_call_operand.vmem [shape: f32[1,128], index: 4, kind: input, shape index: {}]   ;;  %s2578_s5 = inlined_call_operand.hbm [shape: f32[64,16,128], index: 5, kind: output, shape index: {}]  }
   0x1   :  { %12 = vsyncpa [#allocation3 + $0x1], 0 }
   0x2   :  { %13 = vsyncpa [#allocation6], 0 }
   0x3   :  { %14 = vsyncpa [#allocation4], 0 }
   0x4   :  { %16 = vsyncpa [#allocation4 + $0x1], 0  ;;  %s2083_s18 = smov 0   ;;  %s2085_s19 = smov 0  }
   0x5   :  { %s2087_s20 = smov 0   ;;  %s2089_s21 = smov 0  }
   0x6 LB: > { %s2104_s22 = sadd.s32 4294967295, %s2041_s21   ;;  %s1463_s23 = sadd.s32 4294967294, %s2041_s21   ;;  %s2041_s21 = sphi %s2089_s21, %s2601_s21   ;;  %s2037_s20 = sphi %s2087_s20, %s2600_s20   ;;  %s2033_s19 = sphi %s2085_s19, %s2599_s19   ;;  %s2029_s18 = sphi %s2083_s18, %s2598_s18  }
   0x7   : > { %p42_p0 = scmp.ne.s32.totalorder %s2033_s19, %s2029_s18  ;;  %p2579_p1 = scmp.eq.s32.totalorder %s2104_s22, 0 }
   0x8   : > { %p156_p3 = scmp.eq.s32.totalorder %s1463_s23, 7  ;;  %p1464_p5 = scmp.ge.s32.totalorder %s2041_s21, 1 }
   0x9   : > { %p2113_p4 = por %p2579_p1, %p42_p0  ;;  %p163_p7 = scmp.lt.s32.totalorder %s2041_s21, 9 }
   0xa   : > { %p2118_p6 = por %p156_p3, %p42_p0  ;;  %s2043_s27 = smov [#allocation5]  }
   0xb   : > { %s2582_s24 = scalar_select %p2113_p4, 1, 0 }
   0xc   : > { %s2583_s25 = scalar_select %p2118_p6, 1, 0 }
   0xd   : > { %p2123_p8 = pnand %p1464_p5, %p163_p7  ;;  %s175_s28 = sshll.u32 %s2043_s27, 4  ;;  %s176_s28 = int_to_ptr.vmem [resolvable:$true] %s175_s28 }
   0xe   : > { %s2044_s30 = smov [#allocation7]   ;;  %s1885_s9 = scalar_lea.hbm %s2574_s1, 3072 }
   0xf   : > { %s2584_s26 = scalar_select %p2123_p8, 1, 0 }
  0x10   : > { %p1773_p9 = pneg %p2123_p8  ;;  %s191_s6 = sshll.u32 %s2044_s30, 4  ;;  %s2135_s6 = int_to_ptr.vmem [resolvable:$true] %s191_s6 }
  0x11   : > { %p1886_p11 = scmp.ne.s32.totalorder %s2574_s1, %s1885_s9  ;;  %p1892_p3 = scmp.lt.u32.totalorder %s1885_s9, %s2574_s1 }
  0x12   : > { %p2131_p10 = pnand %p1773_p9, %p2579_p1 }
  0x14   : > { %p1887_p12 = pneg %p2131_p10 }
  0x16   : > { %p1888_p13 = pnand %p1887_p12, %p1886_p11 }
  0x18   : > { %p1889_p0 = pneg %p1888_p13 }
  0x1a   : > { %p1894_p5 = pnand %p1892_p3, %p1889_p0 }
  0x1c   : > { %1897 = shalt.err (!%p1894_p5)
}
  0x1d   : > { %s1898_s14 = scalar_lea.vmem %s176_s28, 3072  ;;  %p1906_p2 = scmp.lt.s32.totalorder %s176_s28, %s176_s28 }
  0x1e   : > { %p1899_p7 = scmp.ne.s32.totalorder %s176_s28, %s1898_s14  ;;  %p1907_p6 = scmp.lt.s32.totalorder %s1898_s14, %s1898_s14 }
  0x20   : > { %p1901_p9 = pnand %p1899_p7, %p1887_p12  ;;  %p1908_p4 = por %p1907_p6, %p1906_p2 }
  0x22   : > { %p1902_p1 = pneg %p1901_p9 }
  0x24   : > { %p1909_p8 = pnand %p1908_p4, %p1902_p1 }
  0x26   : > { %1912 = shalt.err (!%p1909_p8)
}
  0x27   : > { %s2045_s15 = smov 64   ;;  %s2046_s16 = smov 4  }
  0x28   : > { %1776 = dma.hbm_to_vmem [thread:$0]  (!%p2131_p10), %s2574_s1, 3072, %s176_s28, [#allocation6], %s2045_s15, %s2045_s15, %s2046_s16  }
  0x29   : > { %s1913_s7 = scalar_lea.hbm %s2576_s3, 3072 }
  0x2a   : > { %p1914_p11 = scmp.ne.s32.totalorder %s2576_s3, %s1913_s7  ;;  %p1920_p4 = scmp.lt.u32.totalorder %s1913_s7, %s2576_s3 }
  0x2c   : > { %p1916_p1 = pnand %p1914_p11, %p1887_p12 }
  0x2e   : > { %p1917_p2 = pneg %p1916_p1 }
  0x30   : > { %p1922_p6 = pnand %p1920_p4, %p1917_p2 }
  0x32   : > { %1925 = shalt.err (!%p1922_p6)
}
  0x33   : > { %s1926_s28 = scalar_lea.vmem %s2135_s6, 3072  ;;  %p1934_p3 = scmp.lt.s32.totalorder %s2135_s6, %s2135_s6 }
  0x34   : > { %p1927_p8 = scmp.ne.s32.totalorder %s2135_s6, %s1926_s28  ;;  %p1935_p5 = scmp.lt.s32.totalorder %s1926_s28, %s1926_s28 }
  0x36   : > { %p1929_p13 = pnand %p1927_p8, %p1887_p12  ;;  %p1936_p7 = por %p1935_p5, %p1934_p3 }
  0x38   : > { %p1930_p0 = pneg %p1929_p13 }
  0x3a   : > { %p1937_p9 = pnand %p1936_p7, %p1930_p0 }
  0x3c   : > { %1940 = shalt.err (!%p1937_p9)
}
  0x3d   : > { %1779 = dma.hbm_to_vmem [thread:$0]  (!%p2131_p10), %s2576_s3, 3072, %s2135_s6, [#allocation6], %s2045_s15, %s2045_s15, %s2046_s16  }
  0x3e   : > { %s2185_s14 = sadd.s32 1, %s2041_s21   ;;  %s29_s29 = sadd.s32 1, %s2037_s20 }
  0x3f   : > { %s26_s17 = ssub.s32 %s2041_s21, %s2185_s14  ;;  %p36_p12 = scmp.ne.s32.totalorder %s2037_s20, %s2033_s19 }
  0x40   : > { %p27_p11 = scmp.eq.s32.totalorder %s26_s17, 0  ;;  %p37_p1 = scmp.eq.s32.totalorder %s2041_s21, 0 }
  0x41   : > { %p2586_p2 = scmp.eq.s32.totalorder %s2104_s22, 7  ;;  %p1790_p6 = scmp.lt.s32.totalorder %s2041_s21, 8 }
  0x42   : > { %s2201_s27 = scalar_select %p27_p11, %s2037_s20, %s29_s29  }
  0x43   : > { %p2195_p4 = por %p2586_p2, %p36_p12  ;;  %p38_p8 = por %p37_p1, %p36_p12 }
  0x44   : > { %s208_s30 = sand.u32 1, %s2037_s20   ;;  %s1534_s6 = sshll.u32 %s2041_s21, 11 }
  0x45   : > { %s1468_s7 = sshll.u32 %s208_s30, 7  ;;  %s2208_s8 = scalar_lea.hbm %s2573_s0, %s1534_s6 }
  0x46   : > { %s212_s9 = scalar_lea.vmem [#allocation2], %s1468_s7  ;;  %p2212_p10 = pnand %p1790_p6, %p38_p8 }
  0x47   : > { %s220_s10 = sshll.u32 %s212_s9, 4  ;;  %s2216_s28 = scalar_lea.sflag [#allocation3], %s208_s30  ;;  %s2210_s10 = int_to_ptr.vmem [resolvable:$true] %s220_s10 }
  0x48   : > { %s1941_s12 = scalar_lea.hbm %s2208_s8, 2048  ;;  %p1943_p0 = pneg %p2212_p10 }
  0x49   : > { %p1942_p13 = scmp.ne.s32.totalorder %s2208_s8, %s1941_s12  ;;  %s1946_s17 = scalar_lea.hbm %s2573_s0, 16384 }
  0x4a   : > { %p1947_p7 = scmp.lt.u32.totalorder %s2208_s8, %s2573_s0  ;;  %p1948_p9 = scmp.lt.u32.totalorder %s1946_s17, %s1941_s12 }
  0x4b   : > { %p1944_p3 = pnand %p1943_p0, %p1942_p13  ;;  %p1950_p11 = scmp.lt.u32.totalorder %s1941_s12, %s2208_s8 }
  0x4c   : > { %p1949_p12 = por %p1948_p9, %p1947_p7 }
  0x4d   : > { %p1945_p5 = pneg %p1944_p3 }
  0x4e   : > { %p1951_p1 = por %p1950_p11, %p1949_p12 }
  0x50   : > { %p1952_p2 = pnand %p1951_p1, %p1945_p5 }
  0x52   : > { %1955 = shalt.err (!%p1952_p2)
}
  0x53   : > { %s1956_s30 = scalar_lea.vmem %s2210_s10, 2048  ;;  %s2047_s15 = smov [#allocation2]  }
  0x54   : > { %p1957_p6 = scmp.ne.s32.totalorder %s2210_s10, %s1956_s30  ;;  %s1961_s16 = sshll.u32 %s2047_s15, 4  ;;  %s1962_s16 = int_to_ptr.vmem [resolvable:$false] %s1961_s16 }
  0x55   : > { %s1963_s9 = scalar_lea.vmem %s1962_s16, 4096  ;;  %p1964_p3 = scmp.lt.s32.totalorder %s2210_s10, %s1962_s16 }
  0x56   : > { %p1959_p8 = pnand %p1957_p6, %p1943_p0  ;;  %p1965_p7 = scmp.lt.s32.totalorder %s1963_s9, %s1956_s30 }
  0x58   : > { %p1960_p13 = pneg %p1959_p8  ;;  %p1966_p9 = por %p1965_p7, %p1964_p3 }
  0x5a   : > { %p1967_p12 = pnand %p1966_p9, %p1960_p13 }
  0x5c   : > { %1970 = shalt.err (!%p1967_p12)
}
  0x5d   : > { %s2048_s12 = smov 128   ;;  %s2049_s13 = smov 8  }
  0x5e   : > { %1783 = dma.hbm_to_vmem [thread:$0]  (!%p2212_p10), %s2208_s8, 2048, %s2210_s10, %s2216_s28, %s2048_s12, %s2048_s12, %s2049_s13  }
  0x5f   : > { %p2589_p0 = scmp.ne.s32.totalorder %s2584_s26, 0 }
  0x60   : > { %s2247_s29 = sand.u32 (!%p2589_p0), 1, %s2033_s19   ;;  %p2590_p5 = scmp.ne.s32.totalorder (!%p2589_p0), %s2582_s24, 0 }
  0x61   : > { %232 = sbr.rel (%p2589_p0) target bundleno = 668 (0x29c), region = 40  ;;  %s1473_s17 = sshll.u32 (!%p2589_p0), %s2247_s29, 7 }
  0x62   : > { %s235_s7 = scalar_lea.sflag (!%p2589_p0), [#allocation3], %s2247_s29  ;;  %s2253_s6 = scalar_lea.vmem (!%p2589_p0), [#allocation2], %s1473_s17 }
  0x68   : > { %2016 = dma.done.wait (%p2590_p5), %s235_s7, 2048  }
  0x69   : > { %2018 = vsyncadd (%p2590_p5), %s235_s7, 4294965248  ;;  %p2591_p10 = scmp.eq.s32.totalorder %s2104_s22, 0 }
  0x6b   : > { %2020 = dma.done.wait (%p2591_p10), [#allocation6], 6144   ;;  %p2592_p11 = pmov %p2591_p10 }
  0x6c   : > { %v1834_v0 = vld [vmem:[#allocation5 + $0x40] sm:$0xff]   ;;  %v1837_v3 = vld [vmem:[#allocation5 + $0x48] sm:$0xff]   ;;  %v1840_v6 = vld [vmem:[#allocation5 + $0x50] sm:$0xff]   ;;  %vm364_vm0 = vcmask 1040384   ;;  %vm365_vm1 = vsmask.f32 256 }
  0x6d   : > { %2022 = vsyncadd (%p2592_p11), [#allocation6], 4294961152  ;;  %v1835_v1 = vld [vmem:[#allocation5] sm:$0xff]   ;;  %1537 = vmatprep.subr.bf16.mxu0 %v1834_v0  ;;  %v1838_v4 = vld [vmem:[#allocation5 + $0x8] sm:$0xff]   ;;  %vm399_vm2 = vcmask 1047552   ;;  %s2477_s11 = scalar_lea.vmem [#allocation8], %s1473_s17 }
  0x6e   : > { %v1836_v2 = vld [vmem:[#allocation5 + $0x80] sm:$0xff]   ;;  %1538 = vmatpush3.bf16.msra.mxu0 %v1835_v1  ;;  %v1839_v5 = vld [vmem:[#allocation5 + $0x88] sm:$0xff]   ;;  %v1841_v7 = vld [vmem:[#allocation5 + $0x10] sm:$0xff]   ;;  %vm400_vm3 = vsmask.f32 7424  ;;  %s1536_s28 = sshll.u32 %s2104_s22, 11 }
  0x6f   : > { %1697 = vmatprep.subr.bf16.mxu1 %v1836_v2  ;;  %1539 = vmatprep.subr.bf16.mxu0 %v1837_v3  ;;  %v1842_v8 = vld [vmem:[#allocation5 + $0x90] sm:$0xff]   ;;  %v1843_v9 = vld [vmem:[#allocation5 + $0x58] sm:$0xff]   ;;  %v1846_v12 = vld [vmem:[#allocation5 + $0x60] sm:$0xff]   ;;  %s1371_s30 = sshll.u32 %s2477_s11, 4  ;;  %s2525_s9 = scalar_lea.hbm %s2578_s5, %s1536_s28  ;;  %s2527_s30 = int_to_ptr.vmem [resolvable:$true] %s1371_s30 }
  0x70   : > { %1698 = vmatpush3.bf16.msra.mxu1 %v1836_v2  ;;  %v1844_v10 = vld [vmem:[#allocation5 + $0x18] sm:$0xff]   ;;  %v1848_v13 = vld [vmem:[#allocation5 + $0xa0] sm:$0xff]   ;;  %v1849_v15 = vld [vmem:[#allocation5 + $0x68] sm:$0xff]   ;;  %s1357_s22 = scalar_lea.sflag [#allocation4], %s2247_s29  ;;  %s1971_s12 = scalar_lea.vmem %s2527_s30, 2048 }
  0x71   : > { %1699 = vmatprep.subr.bf16.mxu1 %v1839_v5  ;;  %v1845_v11 = vld [vmem:[#allocation5 + $0x98] sm:$0xff]   ;;  %v1847_v14 = vld [vmem:[#allocation5 + $0x20] sm:$0xff]   ;;  %v1851_v16 = vld [vmem:[#allocation5 + $0xa8] sm:$0xff]   ;;  %p1972_p1 = scmp.ne.s32.totalorder %s2527_s30, %s1971_s12  ;;  %s2050_s13 = smov [#allocation8]  }
  0x72   : > { %1540 = vmatpush3.bf16.msra.mxu0 %v1838_v4  ;;  %v1850_v17 = vld [vmem:[#allocation5 + $0x28] sm:$0xff]   ;;  %v1852_v18 = vld [vmem:[#allocation5 + $0x70] sm:$0xff]   ;;  %v1855_v21 = vld [vmem:[#allocation5 + $0x78] sm:$0xff]   ;;  %s1975_s17 = sshll.u32 %s2050_s13, 4  ;;  %s1976_s17 = int_to_ptr.vmem [resolvable:$false] %s1975_s17 }
  0x73   : > { %1541 = vmatprep.subr.bf16.mxu0 %v1840_v6  ;;  %v1853_v19 = vld [vmem:[#allocation5 + $0x30] sm:$0xff]   ;;  %v2264_v22 = vld [vmem:[%s2253_s6] sm:$0xff]  ;;  %v2267_v23 = vld [vmem:[%s2253_s6 + $0x8] sm:$0xff]  ;;  %p1973_p2 = pnand %p1972_p1, %p2195_p4  ;;  %s1977_s7 = scalar_lea.vmem %s1976_s17, 4096 }
  0x74   : > { %1700 = vmatpush3.bf16.msra.mxu1 %v1839_v5  ;;  %v1854_v20 = vld [vmem:[#allocation5 + $0xb0] sm:$0xff]   ;;  %v292_v25 = vpack.c.bf16 %v2267_v23, %v2264_v22  ;;  %v2275_v26 = vld [vmem:[%s2253_s6 + $0x18] sm:$0xff]  ;;  %v2278_v27 = vld [vmem:[%s2253_s6 + $0x20] sm:$0xff]  ;;  %p1978_p8 = scmp.lt.s32.totalorder %s2527_s30, %s1976_s17  ;;  %p1979_p13 = scmp.lt.s32.totalorder %s1977_s7, %s1971_s12 }
  0x75   : > { %1701 = vmatprep.subr.bf16.mxu1 %v1842_v8  ;;  %v2270_v24 = vld [vmem:[%s2253_s6 + $0x10] sm:$0xff]  ;;  %v2281_v28 = vld [vmem:[%s2253_s6 + $0x28] sm:$0xff]  ;;  %v1857_v29 = vld [vmem:[#allocation5 + $0xb8] sm:$0xff]   ;;  %p1974_p6 = pneg %p1973_p2 }
  0x76   : > { %1542 = vmatpush3.bf16.msra.mxu0 %v1841_v7  ;;  %v293_v30 = vpack.c.bf16 %v2275_v26, %v2270_v24  ;;  %v2287_v31 = vpack.c.bf16 %v2281_v28, %v2278_v27  ;;  %v2290_v32 = vld [vmem:[%s2253_s6 + $0x30] sm:$0xff]  ;;  %v2293_v33 = vld [vmem:[%s2253_s6 + $0x38] sm:$0xff]  ;;  %641 = vmatprep.mubr.bf16.mxu0 %v292_v25  ;;  %v301_v35 = vshrl.u32 %v292_v25, 16  ;;  %v304_v36 = vshll.u32 %v292_v25, 16  ;;  %vm2302_vm4 = vmand %vm364_vm0, %vm365_vm1  ;;  %p1980_p3 = por %p1979_p13, %p1978_p8 }
  0x77   : > { %1543 = vmatprep.subr.bf16.mxu0 %v1843_v9  ;;  %v1856_v34 = vld [vmem:[#allocation5 + $0x38] sm:$0xff]   ;;  %v2297_v37 = vpack.c.bf16 %v2293_v33, %v2290_v32  ;;  %vm2309_vm5 = vmand %vm399_vm2, %vm400_vm3  ;;  %v2315_v51 = vld [vmem:[%s2253_s6 + $0x40] sm:$0xff] }
  0x78   : > { %1702 = vmatpush3.bf16.msra.mxu1 %v1842_v8  ;;  %v308_v38 = vshrl.u32 %v293_v30, 16  ;;  %v311_v39 = vshll.u32 %v293_v30, 16  ;;  %v318_v40 = vshll.u32 %v2287_v31, 16  ;;  %v303_v41 = vrot.slane %v301_v35, 7  ;;  %v2318_v52 = vld [vmem:[%s2253_s6 + $0x48] sm:$0xff]  ;;  %v2321_v53 = vld [vmem:[%s2253_s6 + $0x50] sm:$0xff]  ;;  %p1981_p7 = pnand %p1980_p3, %p1974_p6 }
  0x79   : > { %1703 = vmatprep.subr.bf16.mxu1 %v1845_v11  ;;  %v375_v43 = vrot.slane %v304_v36, 1  ;;  %v315_v44 = vshrl.u32 %v2287_v31, 16  ;;  %v325_v45 = vshll.u32 %v2297_v37, 16  ;;  %v322_v50 = vshrl.u32 %v2297_v37, 16  ;;  %v2324_v54 = vld [vmem:[%s2253_s6 + $0x58] sm:$0xff]  ;;  %v2329_v58 = vld [vmem:[%s2253_s6 + $0x60] sm:$0xff] }
  0x7a   : > { %1544 = vmatpush3.bf16.msra.mxu0 %v1844_v10  ;;  %v377_v47 = vrot.slane %v311_v39, 1  ;;  %v310_v48 = vrot.slane %v308_v38, 7  ;;  %v379_v49 = vrot.slane %v318_v40, 1  ;;  %v306_v55 = vor.u32 %v304_v36, %v303_v41  ;;  %v289_v59 = vld [vmem:[%s2253_s6 + $0x68] sm:$0xff]  ;;  %v290_v60 = vld [vmem:[%s2253_s6 + $0x70] sm:$0xff]  ;;  %v291_v61 = vld [vmem:[%s2253_s6 + $0x78] sm:$0xff] }
  0x7b   : > { %1545 = vmatprep.subr.bf16.mxu0 %v1846_v12  ;;  %v376_v56 = vor.u32 %v375_v43, %v301_v35  ;;  %v381_v57 = vrot.slane %v325_v45, 1  ;;  %v1858_v62 = vld [vmem:[#allocation7 + $0x40] sm:$0xff]   ;;  %v1860_v9 = vld [vmem:[#allocation7 + $0x48] sm:$0xff]   ;;  %v317_v10 = vrot.slane %v315_v44, 7  ;;  %v297_v12 = vpack.c.bf16 %v2324_v54, %v2321_v53  ;;  %v1863_v35 = vld [vmem:[#allocation7 + $0x50] sm:$0xff]  }
  0x7c   : > { %1704 = vmatpush3.bf16.msra.mxu1 %v1845_v11  ;;  %v378_v63 = vor.u32 %v377_v47, %v308_v38  ;;  %v380_v0 = vor.u32 %v379_v49, %v315_v44  ;;  %v367_v1 = vsel %vm2302_vm4, 0, %v306_v55  ;;  %v1859_v3 = vld [vmem:[#allocation7] sm:$0xff]   ;;  %v313_v6 = vor.u32 %v311_v39, %v310_v48  ;;  %v1864_v41 = vld [vmem:[#allocation7 + $0x10] sm:$0xff]  }
  0x7d   : > { %1705 = vmatprep.subr.bf16.mxu1 %v1848_v13  ;;  %v402_v2 = vsel %vm2309_vm5, %v376_v56, 0  ;;  %v1861_v4 = vld [vmem:[#allocation7 + $0x80] sm:$0xff]   ;;  %v382_v8 = vor.u32 %v381_v57, %v322_v50  ;;  %v296_v11 = vpack.c.bf16 %v2318_v52, %v2315_v51  ;;  %v320_v25 = vor.u32 %v318_v40, %v317_v10  ;;  %v1867_v10 = vld [vmem:[#allocation7 + $0x18] sm:$0xff]  }
  0x7e   : > { %1546 = vmatpush3.bf16.msra.mxu0 %v1847_v14  ;;  %1713 = vmatprep.mubr.bf16.mxu1 %v402_v2  ;;  %v403_v5 = vsel %vm2309_vm5, %v378_v63, 0  ;;  %v404_v7 = vsel %vm2309_vm5, %v380_v0, 0  ;;  %v2351_v14 = vpack.c.bf16 %v291_v61, %v290_v60  ;;  %v324_v48 = vrot.slane %v322_v50, 7 }
  0x7f   : > { %1547 = vmatprep.subr.bf16.mxu0 %v1849_v15  ;;  %v332_v15 = vshll.u32 %v296_v11, 16  ;;  %v369_v40 = vsel %vm2302_vm4, 0, %v320_v25  ;;  %v1878_v25 = vld [vmem:[#allocation7 + $0x38] sm:$0xff]  }
  0x80   : > { %1706 = vmatpush3.bf16.msra.mxu1 %v1848_v13  ;;  %v2349_v13 = vpack.c.bf16 %v289_v59, %v2329_v58  ;;  %v353_v39 = vshll.u32 %v2351_v14, 16  ;;  %v350_v57 = vshrl.u32 %v2351_v14, 16  ;;  %v327_v50 = vor.u32 %v325_v45, %v324_v48 }
  0x81   : > { %1707 = vmatprep.subr.bf16.mxu1 %v1851_v16 }
  0x82   : > { %1548 = vmatpush3.bf16.msra.mxu0 %v1850_v17  ;;  %v339_v17 = vshll.u32 %v297_v12, 16  ;;  %v343_v36 = vshrl.u32 %v2349_v13, 16  ;;  %v370_v60 = vsel %vm2302_vm4, 0, %v327_v50 }
  0x83   : > { %1549 = vmatprep.subr.bf16.mxu0 %v1852_v18  ;;  %v1862_v18 = vld [vmem:[#allocation7 + $0x8] sm:$0xff]  }
  0x84   : > { %1708 = vmatpush3.bf16.msra.mxu1 %v1851_v16  ;;  %v336_v16 = vshrl.u32 %v297_v12, 16  ;;  %v345_v2 = vrot.slane %v343_v36, 7 }
  0x85   : > { %1709 = vmatprep.subr.bf16.mxu1 %v1854_v20 }
  0x86   : > { %1550 = vmatpush3.bf16.msra.mxu0 %v1853_v19  ;;  %v368_v19 = vsel %vm2302_vm4, 0, %v313_v6 }
  0x87   : > { %1551 = vmatprep.subr.bf16.mxu0 %v1855_v21  ;;  %v346_v21 = vshll.u32 %v2349_v13, 16 }
  0x88   : > { %1710 = vmatpush3.bf16.msra.mxu1 %v1854_v20  ;;  %v405_v20 = vsel %vm2309_vm5, %v382_v8, 0  ;;  %v1865_v8 = vld [vmem:[#allocation7 + $0x58] sm:$0xff]  }
  0x89   : > { %1711 = vmatprep.subr.bf16.mxu1 %v1857_v29  ;;  %v387_v38 = vrot.slane %v346_v21, 1 }
  0x8a   : > { %1552 = vmatpush3.bf16.msra.mxu0 %v1856_v34  ;;  %v385_v34 = vrot.slane %v339_v17, 1 }
  0x8b   : > { %1729 = vmatprep.subr.bf16.mxu0 %v1861_v4  ;;  %v388_v47 = vor.u32 %v387_v38, %v343_v36  ;;  %v2392_v36 = vld [vmem:[%s2575_s2] ss:$0 sm:$0xff] }
  0x8c   : > { %1712 = vmatpush3.bf16.msra.mxu1 %v1857_v29  ;;  %v329_v29 = vshrl.u32 %v296_v11, 16  ;;  %v386_v44 = vor.u32 %v385_v34, %v336_v16 }
  0x8d   : > { %642 = vmatmul.mubr.bf16.vlgmr.msra.gmra.mrb[0].mxu0 %v367_v1  ;;  %1617 = vmatprep.subr.bf16.mxu1 %v1858_v62  ;;  %v408_v56 = vsel %vm2309_vm5, %v388_v47, 0  ;;  %v338_v1 = vrot.slane %v336_v16, 7  ;;  %v1872_v16 = vld [vmem:[#allocation7 + $0x28] sm:$0xff]  }
  0x8e   : > { %649 = vmatprep.mubr.bf16.mxu0 %v293_v30  ;;  %1730 = vmatpush3.bf16.msra.mxu0 %v1861_v4  ;;  %v383_v30 = vrot.slane %v332_v15, 1  ;;  %v407_v55 = vsel %vm2309_vm5, %v386_v44, 0  ;;  %v331_v61 = vrot.slane %v329_v29, 7 }
  0x8f   : > { %1714 = vmatmul.mubr.bf16.vlgmr.msra.gmra.mrb[0].mxu1 %v403_v5  ;;  %v352_v5 = vrot.slane %v350_v57, 7 }
  0x90   : > { %1717 = vmatprep.mubr.bf16.mxu1 %v404_v7  ;;  %1618 = vmatpush3.bf16.msra.mxu1 %v1859_v3  ;;  %v384_v43 = vor.u32 %v383_v30, %v329_v29  ;;  %v334_v63 = vor.u32 %v332_v15, %v331_v61  ;;  %v348_v3 = vor.u32 %v346_v21, %v345_v2  ;;  %v1873_v15 = vld [vmem:[#allocation7 + $0x98] sm:$0xff]   ;;  %v1879_v21 = vld [vmem:[#allocation7 + $0xa8] sm:$0xff]   ;;  %v1880_v29 = vld [vmem:[#allocation7 + $0xb0] sm:$0xff]  }
  0x91   : > { %1619 = vmatprep.subr.bf16.mxu1 %v1860_v9  ;;  %v355_v6 = vor.u32 %v353_v39, %v352_v5  ;;  %v1866_v9 = vld [vmem:[#allocation7 + $0x88] sm:$0xff]   ;;  %v1881_v30 = vld [vmem:[#allocation7 + $0xb8] sm:$0xff]  }
  0x92   : > { %v406_v49 = vsel %vm2309_vm5, %v384_v43, 0  ;;  %v371_v0 = vsel %vm2302_vm4, 0, %v334_v63  ;;  %v373_v4 = vsel %vm2302_vm4, 0, %v348_v3  ;;  %1731 = vmatprep.subr.bf16.mxu0 %v1866_v9 }
  0x93   : > { %v374_v7 = vsel %vm2302_vm4, 0, %v355_v6  ;;  %1732 = vmatpush3.bf16.msra.mxu0 %v1866_v9 }
  0x94   : > { %1620 = vmatpush3.bf16.msra.mxu1 %v1862_v18  ;;  %v1876_v18 = vld [vmem:[#allocation7 + $0xa0] sm:$0xff]  }
  0x95   : > { %650 = vmatmul.mubr.bf16.gmra.mrb[4].mxu0 %v368_v19  ;;  %1621 = vmatprep.subr.bf16.mxu1 %v1863_v35  ;;  %v1875_v19 = vld [vmem:[#allocation7 + $0x30] sm:$0xff]  }
  0x96   : > { %657 = vmatprep.mubr.bf16.mxu0 %v2287_v31  ;;  %v389_v31 = vrot.slane %v353_v39, 1 }
  0x97   : > { %1718 = vmatmul.mubr.bf16.gmra.mrb[4].mxu1 %v405_v20  ;;  %v1877_v20 = vld [vmem:[#allocation7 + $0x78] sm:$0xff]  }
  0x98   : > { %1721 = vmatprep.mubr.bf16.mxu1 %v406_v49  ;;  %1622 = vmatpush3.bf16.msra.mxu1 %v1864_v41  ;;  %v390_v59 = vor.u32 %v389_v31, %v350_v57 }
  0x99   : > { %1623 = vmatprep.subr.bf16.mxu1 %v1865_v8 }
  0x9a   : > { %v409_v62 = vsel %vm2309_vm5, %v390_v59, 0 }
  0x9c   : > { %1624 = vmatpush3.bf16.msra.mxu1 %v1867_v10 }
  0x9d   : > { %658 = vmatmul.mubr.bf16.gmra.mrb[8].mxu0 %v369_v40 }
  0x9e   : > { %665 = vmatprep.mubr.bf16.mxu0 %v2297_v37  ;;  %v341_v37 = vor.u32 %v339_v17, %v338_v1  ;;  %v1874_v17 = vld [vmem:[#allocation7 + $0x70] sm:$0xff]  }
  0x9f   : > { %1722 = vmatmul.mubr.bf16.gmra.mrb[8].mxu1 %v407_v55 }
  0xa0   : > { %1725 = vmatprep.mubr.bf16.mxu1 %v408_v56  ;;  %v372_v45 = vsel %vm2302_vm4, 0, %v341_v37 }
  0xa5   : > { %666 = vmatmul.mubr.bf16.gmra.mrb[12].mxu0 %v370_v60 }
  0xa6   : > { %673 = vmatprep.mubr.bf16.mxu0 %v296_v11  ;;  %v1868_v11 = vld [vmem:[#allocation7 + $0x60] sm:$0xff]  }
  0xa7   : > { %1726 = vmatmul.mubr.bf16.gmra.mrb[12].mxu1 %v409_v62  ;;  %1625 = vmatprep.subr.bf16.mxu1 %v1868_v11 }
  0xad   : > { %674 = vmatmul.mubr.bf16.gmra.mrb[16].mxu0 %v371_v0 }
  0xae   : > { %681 = vmatprep.mubr.bf16.mxu0 %v297_v12  ;;  %v1870_v12 = vld [vmem:[#allocation7 + $0x90] sm:$0xff]  }
  0xaf   : > { %1733 = vmatprep.subr.bf16.mxu0 %v1870_v12 }
  0xb0   : > { %1734 = vmatpush3.bf16.msra.mxu0 %v1870_v12 }
  0xb1   : > { %1735 = vmatprep.subr.bf16.mxu0 %v1873_v15 }
  0xb4   : > { %1736 = vmatpush3.bf16.msra.mxu0 %v1873_v15 }
  0xb5   : > { %682 = vmatmul.mubr.bf16.gmra.mrb[20].mxu0 %v372_v45  ;;  %1737 = vmatprep.subr.bf16.mxu0 %v1876_v18 }
  0xb6   : > { %689 = vmatprep.mubr.bf16.mxu0 %v2349_v13  ;;  %v1869_v13 = vld [vmem:[#allocation7 + $0x20] sm:$0xff]  }
  0xb7   : > { %1626 = vmatpush3.bf16.msra.mxu1 %v1869_v13 }
  0xb8   : > { %1738 = vmatpush3.bf16.msra.mxu0 %v1876_v18 }
  0xb9   : > { %1739 = vmatprep.subr.bf16.mxu0 %v1879_v21 }
  0xbc   : > { %1740 = vmatpush3.bf16.msra.mxu0 %v1879_v21 }
  0xbd   : > { %690 = vmatmul.mubr.bf16.gmra.mrb[24].mxu0 %v373_v4  ;;  %1741 = vmatprep.subr.bf16.mxu0 %v1880_v29 }
  0xbe   : > { %697 = vmatprep.mubr.bf16.mxu0 %v2351_v14  ;;  %v1871_v14 = vld [vmem:[#allocation7 + $0x68] sm:$0xff]  }
  0xbf   : > { %1627 = vmatprep.subr.bf16.mxu1 %v1871_v14 }
  0xc0   : > { %1628 = vmatpush3.bf16.msra.mxu1 %v1872_v16  ;;  %1742 = vmatpush3.bf16.msra.mxu0 %v1880_v29 }
  0xc1   : > { %1629 = vmatprep.subr.bf16.mxu1 %v1874_v17  ;;  %1743 = vmatprep.subr.bf16.mxu0 %v1881_v30 }
  0xc4   : > { %1630 = vmatpush3.bf16.msra.mxu1 %v1875_v19  ;;  %1744 = vmatpush3.bf16.msra.mxu0 %v1881_v30 }
  0xc5   : > { %698 = vmatmul.mubr.bf16.gmra.mrb[28].mxu0 %v374_v7  ;;  %1631 = vmatprep.subr.bf16.mxu1 %v1877_v20 }
  0xc8   : > { %1632 = vmatpush3.bf16.msra.mxu1 %v1878_v25 }
 0x160   : > { %v1553_v34 = vpop.f32.mrb[0].mxu0 }
 0x161   : > { %v1554_v35 = vpop.f32.mrb[1].mxu0 }
 0x162   : > { %v1555_v38 = vadd.f32 %v1554_v35, %v1553_v34  ;;  %v1715_v39 = vpop.f32.mrb[0].mxu1  ;;  %v1556_v41 = vpop.f32.mrb[2].mxu0 }
 0x163   : > { %v740_v43 = vpop.f32.mrb[1].mxu1  ;;  %v1557_v44 = vpop.f32.mrb[3].mxu0 }
 0x164   : > { %v644_v47 = vadd.f32 %v1555_v38, %v2392_v36  ;;  %v1558_v40 = vadd.f32 %v1557_v44, %v1556_v41  ;;  %v1716_v48 = vpop.f32.mrb[2].mxu1 }
 0x165   : > { %v743_v49 = vpop.f32.mrb[3].mxu1 }
 0x166   : > { %v741_v55 = vadd.f32 %v740_v43, %v644_v47  ;;  %v647_v56 = vadd.f32 %v1558_v40, %v2392_v36 }
 0x168   : > { %v744_v57 = vadd.f32 %v743_v49, %v647_v56  ;;  %v1559_v31 = vpop.f32.mrb[4].mxu0  ;;  %v803_v59 = vmax.f32 %v741_v55, 0.0 }
 0x169   : > { %v1560_v50 = vpop.f32.mrb[5].mxu0 }
 0x16a   : > { %v804_v60 = vmax.f32 %v744_v57, 0.0  ;;  %v1561_v61 = vadd.f32 %v1560_v50, %v1559_v31  ;;  %v1562_v62 = vpop.f32.mrb[6].mxu0  ;;  %v2396_v63 = vpop.f32.mrb[4].mxu1 }
 0x16b   : > { %v1563_v0 = vpop.f32.mrb[7].mxu0  ;;  %v756_v1 = vpop.f32.mrb[5].mxu1 }
 0x16c   : > { %v819_v37 = vpack.c.bf16 %v804_v60, %v803_v59  ;;  %v652_v45 = vadd.f32 %v1561_v61, %v2392_v36  ;;  %v1564_v2 = vadd.f32 %v1563_v0, %v1562_v62  ;;  %v2399_v3 = vpop.f32.mrb[6].mxu1 }
 0x16d   : > { %v759_v4 = vpop.f32.mrb[7].mxu1 }
 0x16e   : > { %v828_v5 = vshrl.u32 %v819_v37, 16  ;;  %v831_v6 = vshll.u32 %v819_v37, 16  ;;  %v749_v7 = vadd.f32 %v1715_v39, %v652_v45  ;;  %v655_v8 = vadd.f32 %v1564_v2, %v2392_v36  ;;  %1162 = vmatprep.mubr.bf16.mxu1 %v819_v37 }
 0x170   : > { %v830_v9 = vrot.slane %v828_v5, 7  ;;  %v752_v10 = vadd.f32 %v1716_v48, %v655_v8  ;;  %v1565_v11 = vpop.f32.mrb[8].mxu0  ;;  %v899_v12 = vrot.slane %v831_v6, 1  ;;  %v805_v20 = vmax.f32 %v749_v7, 0.0 }
 0x171   : > { %v1566_v13 = vpop.f32.mrb[9].mxu0 }
 0x172   : > { %v806_v14 = vmax.f32 %v752_v10, 0.0  ;;  %v1567_v15 = vadd.f32 %v1566_v13, %v1565_v11  ;;  %v1568_v16 = vpop.f32.mrb[10].mxu0  ;;  %v833_v17 = vor.u32 %v831_v6, %v830_v9  ;;  %v900_v18 = vor.u32 %v899_v12, %v828_v5  ;;  %v2402_v19 = vpop.f32.mrb[8].mxu1 }
 0x173   : > { %v1569_v21 = vpop.f32.mrb[11].mxu0  ;;  %v772_v25 = vpop.f32.mrb[9].mxu1 }
 0x174   : > { %v660_v29 = vadd.f32 %v1567_v15, %v2392_v36  ;;  %v1570_v30 = vadd.f32 %v1569_v21, %v1568_v16  ;;  %v891_v34 = vsel %vm2302_vm4, 0, %v833_v17  ;;  %v923_v35 = vsel %vm2309_vm5, %v900_v18, 0  ;;  %v2409_v38 = vpop.f32.mrb[10].mxu1 }
 0x175   : > { %1163 = vmatmul.mubr.bf16.vlgmr.msra.gmra.mrb[16].mxu1 %v891_v34  ;;  %1745 = vmatprep.mubr.bf16.mxu0 %v923_v35  ;;  %v820_v39 = vpack.c.bf16 %v806_v14, %v805_v20  ;;  %v775_v41 = vpop.f32.mrb[11].mxu1 }
 0x176   : > { %v757_v43 = vadd.f32 %v756_v1, %v660_v29  ;;  %v663_v44 = vadd.f32 %v1570_v30, %v2392_v36 }
 0x177   : > { %1170 = vmatprep.mubr.bf16.mxu1 %v820_v39  ;;  %v835_v47 = vshrl.u32 %v820_v39, 16  ;;  %v838_v40 = vshll.u32 %v820_v39, 16 }
 0x178   : > { %v760_v48 = vadd.f32 %v759_v4, %v663_v44  ;;  %v1571_v49 = vpop.f32.mrb[12].mxu0  ;;  %v807_v31 = vmax.f32 %v757_v43, 0.0 }
 0x179   : > { %v1572_v55 = vpop.f32.mrb[13].mxu0  ;;  %v837_v56 = vrot.slane %v835_v47, 7  ;;  %v901_v57 = vrot.slane %v838_v40, 1 }
 0x17a   : > { %v808_v50 = vmax.f32 %v760_v48, 0.0  ;;  %v1573_v59 = vadd.f32 %v1572_v55, %v1571_v49  ;;  %v1574_v60 = vpop.f32.mrb[14].mxu0  ;;  %v2412_v61 = vpop.f32.mrb[12].mxu1 }
 0x17b   : > { %v1575_v62 = vpop.f32.mrb[15].mxu0  ;;  %v840_v0 = vor.u32 %v838_v40, %v837_v56  ;;  %v902_v37 = vor.u32 %v901_v57, %v835_v47  ;;  %v2414_v1 = vpop.f32.mrb[13].mxu1 }
 0x17c   : > { %v821_v45 = vpack.c.bf16 %v808_v50, %v807_v31  ;;  %v668_v2 = vadd.f32 %v1573_v59, %v2392_v36  ;;  %v1576_v5 = vadd.f32 %v1575_v62, %v1574_v60  ;;  %v2417_v4 = vpop.f32.mrb[14].mxu1 }
 0x17d   : > { %v892_v6 = vsel %vm2302_vm4, 0, %v840_v0  ;;  %v924_v7 = vsel %vm2309_vm5, %v902_v37, 0  ;;  %v2423_v8 = vpop.f32.mrb[15].mxu1 }
 0x17e   : > { %v842_v9 = vshrl.u32 %v821_v45, 16  ;;  %v765_v10 = vadd.f32 %v2396_v63, %v668_v2  ;;  %v671_v11 = vadd.f32 %v1576_v5, %v2392_v36  ;;  %1171 = vmatmul.mubr.bf16.gmra.mrb[20].mxu1 %v892_v6  ;;  %1746 = vmatmul.mubr.bf16.vlgmr.msra.gmra.mrb[32].mxu0 %v924_v7  ;;  %v845_v12 = vshll.u32 %v821_v45, 16 }
 0x17f   : > { %1178 = vmatprep.mubr.bf16.mxu1 %v821_v45 }
 0x180   : > { %v768_v13 = vadd.f32 %v2399_v3, %v671_v11  ;;  %v1577_v14 = vpop.f32.mrb[16].mxu0  ;;  %v844_v15 = vrot.slane %v842_v9, 7  ;;  %v903_v16 = vrot.slane %v845_v12, 1  ;;  %v809_v34 = vmax.f32 %v765_v10, 0.0 }
 0x181   : > { %v1578_v17 = vpop.f32.mrb[17].mxu0 }
 0x182   : > { %v810_v18 = vmax.f32 %v768_v13, 0.0  ;;  %v1579_v20 = vadd.f32 %v1578_v17, %v1577_v14  ;;  %v1580_v21 = vpop.f32.mrb[18].mxu0  ;;  %v847_v29 = vor.u32 %v845_v12, %v844_v15  ;;  %v904_v30 = vor.u32 %v903_v16, %v842_v9 }
 0x183   : > { %v1581_v35 = vpop.f32.mrb[19].mxu0 }
 0x184   : > { %v676_v63 = vadd.f32 %v1579_v20, %v2392_v36  ;;  %v1582_v39 = vadd.f32 %v1581_v35, %v1580_v21  ;;  %v893_v43 = vsel %vm2302_vm4, 0, %v847_v29  ;;  %v925_v3 = vsel %vm2309_vm5, %v904_v30, 0 }
 0x185   : > { %1749 = vmatprep.mubr.bf16.mxu0 %v925_v3  ;;  %v822_v44 = vpack.c.bf16 %v810_v18, %v809_v34 }
 0x186   : > { %v773_v47 = vadd.f32 %v772_v25, %v676_v63  ;;  %v679_v40 = vadd.f32 %v1582_v39, %v2392_v36  ;;  %1179 = vmatmul.mubr.bf16.gmra.mrb[24].mxu1 %v893_v43 }
 0x187   : > { %1186 = vmatprep.mubr.bf16.mxu1 %v822_v44  ;;  %v849_v48 = vshrl.u32 %v822_v44, 16  ;;  %v852_v49 = vshll.u32 %v822_v44, 16 }
 0x188   : > { %v776_v55 = vadd.f32 %v775_v41, %v679_v40  ;;  %v1583_v56 = vpop.f32.mrb[20].mxu0  ;;  %v811_v59 = vmax.f32 %v773_v47, 0.0 }
 0x189   : > { %v1584_v57 = vpop.f32.mrb[21].mxu0  ;;  %v851_v31 = vrot.slane %v849_v48, 7  ;;  %v905_v50 = vrot.slane %v852_v49, 1 }
 0x18a   : > { %v812_v60 = vmax.f32 %v776_v55, 0.0  ;;  %v1585_v62 = vadd.f32 %v1584_v57, %v1583_v56  ;;  %v1586_v0 = vpop.f32.mrb[22].mxu0 }
 0x18b   : > { %v1587_v37 = vpop.f32.mrb[23].mxu0  ;;  %v854_v45 = vor.u32 %v852_v49, %v851_v31  ;;  %v906_v2 = vor.u32 %v905_v50, %v849_v48 }
 0x18c   : > { %v823_v5 = vpack.c.bf16 %v812_v60, %v811_v59  ;;  %v684_v25 = vadd.f32 %v1585_v62, %v2392_v36  ;;  %v1588_v6 = vadd.f32 %v1587_v37, %v1586_v0 }
 0x18d   : > { %v894_v7 = vsel %vm2302_vm4, 0, %v854_v45  ;;  %v926_v41 = vsel %vm2309_vm5, %v906_v2, 0 }
 0x18e   : > { %v856_v9 = vshrl.u32 %v823_v5, 16  ;;  %v781_v10 = vadd.f32 %v2402_v19, %v684_v25  ;;  %v687_v11 = vadd.f32 %v1588_v6, %v2392_v36  ;;  %1187 = vmatmul.mubr.bf16.gmra.mrb[28].mxu1 %v894_v7  ;;  %1750 = vmatmul.mubr.bf16.gmra.mrb[36].mxu0 %v926_v41  ;;  %v859_v12 = vshll.u32 %v823_v5, 16 }
 0x18f   : > { %1194 = vmatprep.mubr.bf16.mxu1 %v823_v5 }
 0x190   : > { %v784_v13 = vadd.f32 %v2409_v38, %v687_v11  ;;  %v1589_v14 = vpop.f32.mrb[24].mxu0  ;;  %v858_v15 = vrot.slane %v856_v9, 7  ;;  %v907_v16 = vrot.slane %v859_v12, 1  ;;  %v813_v34 = vmax.f32 %v781_v10, 0.0 }
 0x191   : > { %v1590_v17 = vpop.f32.mrb[25].mxu0 }
 0x192   : > { %v814_v18 = vmax.f32 %v784_v13, 0.0  ;;  %v1591_v20 = vadd.f32 %v1590_v17, %v1589_v14  ;;  %v1592_v21 = vpop.f32.mrb[26].mxu0  ;;  %v861_v29 = vor.u32 %v859_v12, %v858_v15  ;;  %v908_v30 = vor.u32 %v907_v16, %v856_v9 }
 0x193   : > { %v1593_v35 = vpop.f32.mrb[27].mxu0 }
 0x194   : > { %v692_v19 = vadd.f32 %v1591_v20, %v2392_v36  ;;  %v1594_v63 = vadd.f32 %v1593_v35, %v1592_v21  ;;  %v895_v39 = vsel %vm2302_vm4, 0, %v861_v29  ;;  %v927_v38 = vsel %vm2309_vm5, %v908_v30, 0 }
 0x195   : > { %1753 = vmatprep.mubr.bf16.mxu0 %v927_v38  ;;  %v824_v43 = vpack.c.bf16 %v814_v18, %v813_v34 }
 0x196   : > { %v789_v3 = vadd.f32 %v2414_v1, %v692_v19  ;;  %v695_v44 = vadd.f32 %v1594_v63, %v2392_v36  ;;  %1195 = vmatmul.mubr.bf16.gmra.mrb[32].mxu1 %v895_v39 }
 0x197   : > { %1202 = vmatprep.mubr.bf16.mxu1 %v824_v43  ;;  %v863_v47 = vshrl.u32 %v824_v43, 16  ;;  %v866_v40 = vshll.u32 %v824_v43, 16 }
 0x198   : > { %v792_v48 = vadd.f32 %v2423_v8, %v695_v44  ;;  %v1595_v49 = vpop.f32.mrb[28].mxu0  ;;  %v815_v31 = vmax.f32 %v789_v3, 0.0  ;;  %v2469_v3 = vld [vmem:[%s2577_s4] ss:$0 sm:$0xff] }
 0x199   : > { %v1596_v55 = vpop.f32.mrb[29].mxu0  ;;  %v865_v56 = vrot.slane %v863_v47, 7  ;;  %v909_v57 = vrot.slane %v866_v40, 1 }
 0x19a   : > { %v816_v50 = vmax.f32 %v792_v48, 0.0  ;;  %v1597_v59 = vadd.f32 %v1596_v55, %v1595_v49  ;;  %v1598_v60 = vpop.f32.mrb[30].mxu0 }
 0x19b   : > { %v1599_v62 = vpop.f32.mrb[31].mxu0  ;;  %v868_v0 = vor.u32 %v866_v40, %v865_v56  ;;  %v910_v37 = vor.u32 %v909_v57, %v863_v47 }
 0x19c   : > { %v825_v1 = vpack.c.bf16 %v816_v50, %v815_v31  ;;  %v700_v45 = vadd.f32 %v1597_v59, %v2392_v36  ;;  %v1600_v2 = vadd.f32 %v1599_v62, %v1598_v60 }
 0x19d   : > { %v896_v5 = vsel %vm2302_vm4, 0, %v868_v0  ;;  %v928_v8 = vsel %vm2309_vm5, %v910_v37, 0 }
 0x19e   : > { %v870_v25 = vshrl.u32 %v825_v1, 16  ;;  %v797_v6 = vadd.f32 %v2412_v61, %v700_v45  ;;  %v703_v7 = vadd.f32 %v1600_v2, %v2392_v36  ;;  %1203 = vmatmul.mubr.bf16.gmra.mrb[36].mxu1 %v896_v5  ;;  %1754 = vmatmul.mubr.bf16.gmra.mrb[40].mxu0 %v928_v8  ;;  %v873_v41 = vshll.u32 %v825_v1, 16 }
 0x19f   : > { %1210 = vmatprep.mubr.bf16.mxu1 %v825_v1 }
 0x1a0   : > { %v800_v9 = vadd.f32 %v2417_v4, %v703_v7  ;;  %v872_v10 = vrot.slane %v870_v25, 7  ;;  %v911_v11 = vrot.slane %v873_v41, 1  ;;  %v817_v12 = vmax.f32 %v797_v6, 0.0 }
 0x1a2   : > { %v818_v13 = vmax.f32 %v800_v9, 0.0  ;;  %v875_v14 = vor.u32 %v873_v41, %v872_v10  ;;  %v912_v15 = vor.u32 %v911_v11, %v870_v25 }
 0x1a4   : > { %v897_v16 = vsel %vm2302_vm4, 0, %v875_v14  ;;  %v929_v61 = vsel %vm2309_vm5, %v912_v15, 0  ;;  %v826_v17 = vpack.c.bf16 %v818_v13, %v817_v12 }
 0x1a5   : > { %1757 = vmatprep.mubr.bf16.mxu0 %v929_v61 }
 0x1a6   : > { %1211 = vmatmul.mubr.bf16.gmra.mrb[40].mxu1 %v897_v16  ;;  %v877_v36 = vshrl.u32 %v826_v17, 16  ;;  %v880_v18 = vshll.u32 %v826_v17, 16 }
 0x1a7   : > { %1218 = vmatprep.mubr.bf16.mxu1 %v826_v17 }
 0x1a8   : > { %v879_v20 = vrot.slane %v877_v36, 7  ;;  %v913_v4 = vrot.slane %v880_v18, 1 }
 0x1aa   : > { %v882_v21 = vor.u32 %v880_v18, %v879_v20  ;;  %v914_v29 = vor.u32 %v913_v4, %v877_v36 }
 0x1ac   : > { %v898_v30 = vsel %vm2302_vm4, 0, %v882_v21  ;;  %v930_v34 = vsel %vm2309_vm5, %v914_v29, 0 }
 0x1ad   : > { %1758 = vmatmul.mubr.bf16.gmra.mrb[44].mxu0 %v930_v34 }
 0x1ae   : > { %1219 = vmatmul.mubr.bf16.gmra.mrb[44].mxu1 %v898_v30 }
 0x248   : > { %v1633_v35 = vpop.f32.mrb[16].mxu1 }
 0x249   : > { %v1634_v19 = vpop.f32.mrb[17].mxu1 }
 0x24a   : > { %v1635_v63 = vadd.f32 %v1634_v19, %v1633_v35  ;;  %v1636_v39 = vpop.f32.mrb[18].mxu1 }
 0x24b   : > { %v1637_v38 = vpop.f32.mrb[19].mxu1 }
 0x24c   : > { %v1638_v43 = vadd.f32 %v1637_v38, %v1636_v39  ;;  %v1165_v42 = vadd.f32 %v1635_v63, %v2469_v3 }
 0x24e   : > { %v1168_v57 = vadd.f32 %v1638_v43, %v2469_v3 }
 0x251   : > { %v1639_v44 = vpop.f32.mrb[20].mxu1  ;;  %v1747_v47 = vpop.f32.mrb[32].mxu0 }
 0x252   : > { %v1640_v46 = vpop.f32.mrb[21].mxu1  ;;  %v1261_v40 = vpop.f32.mrb[33].mxu0 }
 0x253   : > { %v1641_v48 = vadd.f32 %v1640_v46, %v1639_v44  ;;  %v1262_v49 = vadd.f32 %v1261_v40, %v1165_v42  ;;  %v1642_v55 = vpop.f32.mrb[22].mxu1  ;;  %v1748_v56 = vpop.f32.mrb[34].mxu0 }
 0x254   : > { %v1643_v31 = vpop.f32.mrb[23].mxu1  ;;  %v1264_v50 = vpop.f32.mrb[35].mxu0 }
 0x255   : > { %v1173_v59 = vadd.f32 %v1641_v48, %v2469_v3  ;;  %v1324_v60 = vadd.f32 %v1262_v49, %v2264_v22  ;;  %v1644_v62 = vadd.f32 %v1643_v31, %v1642_v55  ;;  %v1265_v0 = vadd.f32 %v1264_v50, %v1168_v57 }
 0x257   : > { %v1270_v37 = vadd.f32 %v1747_v47, %v1173_v59  ;;  %1340 = vst [vmem:[%s2477_s11] sm:$0xff] %v1324_v60  ;;  %v1176_v1 = vadd.f32 %v1644_v62, %v2469_v3  ;;  %v1325_v45 = vadd.f32 %v1265_v0, %v2267_v23 }
 0x259   : > { %v1326_v2 = vadd.f32 %v1270_v37, %v2270_v24  ;;  %v1273_v5 = vadd.f32 %v1748_v56, %v1176_v1  ;;  %1341 = vst [vmem:[%s2477_s11 + $0x8] sm:$0xff] %v1325_v45  ;;  %v1645_v22 = vpop.f32.mrb[24].mxu1 }
 0x25a   : > { %v1646_v8 = vpop.f32.mrb[25].mxu1 }
 0x25b   : > { %1342 = vst [vmem:[%s2477_s11 + $0x10] sm:$0xff] %v1326_v2  ;;  %v1327_v25 = vadd.f32 %v1273_v5, %v2275_v26  ;;  %v1647_v6 = vadd.f32 %v1646_v8, %v1645_v22  ;;  %v1648_v7 = vpop.f32.mrb[26].mxu1 }
 0x25c   : > { %v1649_v41 = vpop.f32.mrb[27].mxu1 }
 0x25d   : > { %1343 = vst [vmem:[%s2477_s11 + $0x18] sm:$0xff] %v1327_v25  ;;  %v1650_v9 = vadd.f32 %v1649_v41, %v1648_v7  ;;  %v1181_v12 = vadd.f32 %v1647_v6, %v2469_v3 }
 0x25f   : > { %v1184_v61 = vadd.f32 %v1650_v9, %v2469_v3 }
 0x261   : > { %v1651_v10 = vpop.f32.mrb[28].mxu1  ;;  %v1751_v11 = vpop.f32.mrb[36].mxu0 }
 0x262   : > { %v1652_v23 = vpop.f32.mrb[29].mxu1  ;;  %v1277_v13 = vpop.f32.mrb[37].mxu0 }
 0x263   : > { %v1653_v24 = vadd.f32 %v1652_v23, %v1651_v10  ;;  %v1278_v14 = vadd.f32 %v1277_v13, %v1181_v12  ;;  %v1654_v15 = vpop.f32.mrb[30].mxu1  ;;  %v1752_v16 = vpop.f32.mrb[38].mxu0 }
 0x264   : > { %v1655_v26 = vpop.f32.mrb[31].mxu1  ;;  %v1280_v17 = vpop.f32.mrb[39].mxu0 }
 0x265   : > { %v1189_v36 = vadd.f32 %v1653_v24, %v2469_v3  ;;  %v1328_v18 = vadd.f32 %v1278_v14, %v2278_v27  ;;  %v1656_v20 = vadd.f32 %v1655_v26, %v1654_v15  ;;  %v1281_v4 = vadd.f32 %v1280_v17, %v1184_v61  ;;  %v1882_v26 = vld [vmem:[%s2253_s6 + $0x68] sm:$0xff] }
 0x267   : > { %v1286_v21 = vadd.f32 %v1751_v11, %v1189_v36  ;;  %1344 = vst [vmem:[%s2477_s11 + $0x20] sm:$0xff] %v1328_v18  ;;  %v1192_v29 = vadd.f32 %v1656_v20, %v2469_v3  ;;  %v1329_v30 = vadd.f32 %v1281_v4, %v2281_v28 }
 0x269   : > { %v1330_v34 = vadd.f32 %v1286_v21, %v2290_v32  ;;  %v1289_v35 = vadd.f32 %v1752_v16, %v1192_v29  ;;  %1345 = vst [vmem:[%s2477_s11 + $0x28] sm:$0xff] %v1329_v30  ;;  %v1657_v19 = vpop.f32.mrb[32].mxu1  ;;  %v1884_v21 = vld [vmem:[%s2253_s6 + $0x78] sm:$0xff] }
 0x26a   : > { %v1658_v63 = vpop.f32.mrb[33].mxu1 }
 0x26b   : > { %1346 = vst [vmem:[%s2477_s11 + $0x30] sm:$0xff] %v1330_v34  ;;  %v1331_v39 = vadd.f32 %v1289_v35, %v2293_v33  ;;  %v1659_v38 = vadd.f32 %v1658_v63, %v1657_v19  ;;  %v1660_v27 = vpop.f32.mrb[34].mxu1 }
 0x26c   : > { %v1661_v43 = vpop.f32.mrb[35].mxu1 }
 0x26d   : > { %1347 = vst [vmem:[%s2477_s11 + $0x38] sm:$0xff] %v1331_v39  ;;  %v1662_v44 = vadd.f32 %v1661_v43, %v1660_v27  ;;  %v1197_v46 = vadd.f32 %v1659_v38, %v2469_v3 }
 0x26f   : > { %v1200_v56 = vadd.f32 %v1662_v44, %v2469_v3 }
 0x271   : > { %v1663_v47 = vpop.f32.mrb[36].mxu1  ;;  %v1755_v42 = vpop.f32.mrb[40].mxu0 }
 0x272   : > { %v1664_v28 = vpop.f32.mrb[37].mxu1  ;;  %v1293_v40 = vpop.f32.mrb[41].mxu0 }
 0x273   : > { %v1665_v32 = vadd.f32 %v1664_v28, %v1663_v47  ;;  %v1294_v48 = vadd.f32 %v1293_v40, %v1197_v46  ;;  %v1666_v49 = vpop.f32.mrb[38].mxu1  ;;  %v1756_v55 = vpop.f32.mrb[42].mxu0 }
 0x274   : > { %v1667_v33 = vpop.f32.mrb[39].mxu1  ;;  %v1296_v57 = vpop.f32.mrb[43].mxu0 }
 0x275   : > { %v1205_v31 = vadd.f32 %v1665_v32, %v2469_v3  ;;  %v1332_v50 = vadd.f32 %v1294_v48, %v2315_v51  ;;  %v1668_v59 = vadd.f32 %v1667_v33, %v1666_v49  ;;  %v1297_v60 = vadd.f32 %v1296_v57, %v1200_v56 }
 0x277   : > { %v1302_v62 = vadd.f32 %v1755_v42, %v1205_v31  ;;  %1348 = vst [vmem:[%s2477_s11 + $0x40] sm:$0xff] %v1332_v50  ;;  %v1208_v0 = vadd.f32 %v1668_v59, %v2469_v3  ;;  %v1333_v37 = vadd.f32 %v1297_v60, %v2318_v52 }
 0x279   : > { %v1334_v1 = vadd.f32 %v1302_v62, %v2321_v53  ;;  %v1305_v45 = vadd.f32 %v1756_v55, %v1208_v0  ;;  %1349 = vst [vmem:[%s2477_s11 + $0x48] sm:$0xff] %v1333_v37  ;;  %v1669_v2 = vpop.f32.mrb[40].mxu1 }
 0x27a   : > { %v1670_v5 = vpop.f32.mrb[41].mxu1 }
 0x27b   : > { %1350 = vst [vmem:[%s2477_s11 + $0x50] sm:$0xff] %v1334_v1  ;;  %v1335_v22 = vadd.f32 %v1305_v45, %v2324_v54  ;;  %v1671_v8 = vadd.f32 %v1670_v5, %v1669_v2  ;;  %v1672_v51 = vpop.f32.mrb[42].mxu1 }
 0x27c   : > { %v1673_v25 = vpop.f32.mrb[43].mxu1 }
 0x27d   : > { %1351 = vst [vmem:[%s2477_s11 + $0x58] sm:$0xff] %v1335_v22  ;;  %v1674_v6 = vadd.f32 %v1673_v25, %v1672_v51  ;;  %v1213_v41 = vadd.f32 %v1671_v8, %v2469_v3 }
 0x27f   : > { %v1216_v12 = vadd.f32 %v1674_v6, %v2469_v3 }
 0x280   : > { %v1759_v7 = vpop.f32.mrb[44].mxu0 }
 0x281   : > { %v1675_v52 = vpop.f32.mrb[44].mxu1  ;;  %v1309_v9 = vpop.f32.mrb[45].mxu0 }
 0x282   : > { %v1676_v53 = vpop.f32.mrb[45].mxu1  ;;  %v1310_v10 = vadd.f32 %v1309_v9, %v1213_v41  ;;  %v1760_v11 = vpop.f32.mrb[46].mxu0 }
 0x283   : > { %v1677_v54 = vadd.f32 %v1676_v53, %v1675_v52  ;;  %v1678_v23 = vpop.f32.mrb[46].mxu1  ;;  %v1312_v13 = vpop.f32.mrb[47].mxu0 }
 0x284   : > { %v1336_v24 = vadd.f32 %v1310_v10, %v2329_v58  ;;  %v1679_v14 = vpop.f32.mrb[47].mxu1  ;;  %v1313_v15 = vadd.f32 %v1312_v13, %v1216_v12  ;;  %v1883_v58 = vld [vmem:[%s2253_s6 + $0x70] sm:$0xff] }
 0x285   : > { %v1221_v16 = vadd.f32 %v1677_v54, %v2469_v3  ;;  %v1680_v61 = vadd.f32 %v1679_v14, %v1678_v23 }
 0x286   : > { %1352 = vst [vmem:[%s2477_s11 + $0x60] sm:$0xff] %v1336_v24  ;;  %v1337_v17 = vadd.f32 %v1882_v26, %v1313_v15 }
 0x287   : > { %v1318_v36 = vadd.f32 %v1759_v7, %v1221_v16  ;;  %v1224_v18 = vadd.f32 %v1680_v61, %v2469_v3 }
 0x288   : > { %1353 = vst [vmem:[%s2477_s11 + $0x68] sm:$0xff] %v1337_v17 }
 0x289   : > { %v1338_v20 = vadd.f32 %v1883_v58, %v1318_v36  ;;  %v1321_v4 = vadd.f32 %v1760_v11, %v1224_v18 }
 0x28b   : > { %1354 = vst [vmem:[%s2477_s11 + $0x70] sm:$0xff] %v1338_v20  ;;  %v1339_v3 = vadd.f32 %v1884_v21, %v1321_v4 }
 0x28d   : > { %1355 = vst [vmem:[%s2477_s11 + $0x78] sm:$0xff] %v1339_v3 }
 0x28e   : > { %1984 = shalt.err (!%p1981_p7)
}
 0x28f   : > { %s1985_s6 = scalar_lea.hbm %s2525_s9, 2048  ;;  %s1989_s8 = scalar_lea.hbm %s2578_s5, 16384 }
 0x290   : > { %p1986_p9 = scmp.ne.s32.totalorder %s2525_s9, %s1985_s6  ;;  %p1990_p5 = scmp.lt.u32.totalorder %s2525_s9, %s2578_s5 }
 0x291   : > { %p1991_p10 = scmp.lt.u32.totalorder %s1989_s8, %s1985_s6  ;;  %p1993_p1 = scmp.lt.u32.totalorder %s1985_s6, %s2525_s9 }
 0x292   : > { %p1987_p12 = pnand %p1986_p9, %p2195_p4 }
 0x293   : > { %p1992_p11 = por %p1991_p10, %p1990_p5 }
 0x294   : > { %p1988_p0 = pneg %p1987_p12 }
 0x295   : > { %p1994_p2 = por %p1993_p1, %p1992_p11 }
 0x297   : > { %p1995_p6 = pnand %p1994_p2, %p1988_p0 }
 0x299   : > { %1998 = shalt.err (!%p1995_p6)
}
 0x29a   : > { %s2051_s28 = smov 128   ;;  %s2052_s15 = smov 8  }
 0x29b   : > { %1771 = dma.vmem_to_hbm [thread:$0]  (%p2195_p4), %s2527_s30, 2048, %s2525_s9, %s1357_s22, %s2051_s28, %s2051_s28, %s2052_s15  }
 0x29c PF: > { %p1793_p8 = scmp.ge.s32.totalorder %s2041_s21, 2  ;;  %s1386_s16 = sand.u32 1, %s2029_s18  }
 0x29d   : > { %p2597_p13 = scmp.ne.s32.totalorder %s2583_s25, 0  ;;  %s1387_s12 = scalar_lea.sflag [#allocation4], %s1386_s16 }
 0x29f   : > { %p1785_p3 = pnand %p1793_p8, %p2597_p13 }
 0x2a1   : > { %2024 = dma.done.wait (!%p1785_p3), %s1387_s12, 2048  }
 0x2a2   : > { %2026 = vsyncadd (!%p1785_p3), %s1387_s12, 4294965248  ;;  %p19_p7 = scmp.ge.s32.totalorder %s2185_s14, 10   ;;  %s2598_s18 = smov %s2033_s19 }
 0x2a3   : > { %s2599_s19 = smov %s2037_s20  ;;  %s2600_s20 = smov %s2201_s27 }
 0x2a4   : > { %s2601_s21 = smov %s2185_s14  ;;  %21 = sbr.rel (!%p19_p7) target bundleno = 6 (0x6), region = 93 }
 0x2ab   :  { %1392 = vsyncpa [#allocation3], 1 }
 0x2ac   :  { %1394 = vsyncpa [#allocation3 + $0x1], 1 }
 0x2ad   :  { %1395 = vsyncpa [#allocation6], 1 }
 0x2ae   :  { %1396 = vsyncpa [#allocation4], 1 }
 0x2af   :  { %1398 = vsyncpa [#allocation4 + $0x1], 1 }

</bundles_post_ra>
